<compile_context>
chip_gen: v5e
topology: v5e:2x2
jax: 0.10.0
libtpu: 0.0.40
codegen_flags: <defaults>
</compile_context>

<pallas_src>
import jax
import jax.numpy as jnp
from jax import lax
from jax.experimental import pallas as pl
from jax.experimental.pallas import tpu as pltpu


def _round_up(x, m):
    return ((x + m - 1) // m) * m


def _complex_score_kernel(rs_ref, erh_ref, eih_ref, ert_ref, eit_ref,
                          rel_re_ref, rel_im_ref, o_ref):
    f32 = jnp.float32
    h_re = erh_ref[...].astype(f32)
    h_im = eih_ref[...].astype(f32)
    t_re = ert_ref[...].astype(f32)
    t_im = eit_ref[...].astype(f32)

    # Factored ComplEx terms (fewer VALU ops than the 4-product form).
    a = h_re * t_re + h_im * t_im          # multiplies r_re
    b = h_re * t_im - h_im * t_re          # multiplies r_im

    # In-kernel relation gather: exact one-hot selection via the MXU.
    tb = rs_ref.shape[0]
    r_pad = rel_re_ref.shape[0]
    rid = rs_ref[...]                                        # (TB, 1) int32
    lanes = lax.broadcasted_iota(jnp.int32, (tb, r_pad), 1)  # (TB, R_pad)
    onehot = jnp.where(lanes == rid, 1.0, 0.0).astype(rel_re_ref.dtype)
    r_re = jnp.dot(onehot, rel_re_ref[...], preferred_element_type=f32)
    r_im = jnp.dot(onehot, rel_im_ref[...], preferred_element_type=f32)

    # Reduce over emb_dim (lanes); (TB, 1) store.
    o_ref[...] = jnp.sum(r_re * a + r_im * b, axis=1, keepdims=True)


def complex_score(rs, e_re_h, e_im_h, e_re_t, e_im_t, rel_re, rel_im,
                  *, tile_b=512):
    """Pallas ComplEx scorer. Entity streams: (B, D); relation tables: (R, D)."""
    B, D = e_re_h.shape
    R = rel_re.shape[0]

    # Pad relation tables to an MXU/lane-friendly row count (zero rows are
    # inert: the one-hot never selects them).
    R_pad = max(128, _round_up(R, 128))
    if R_pad != R:
        rel_re = jnp.pad(rel_re, ((0, R_pad - R), (0, 0)))
        rel_im = jnp.pad(rel_im, ((0, R_pad - R), (0, 0)))

    # Batch tile: as large as reasonable, multiple of 16 (bf16 sublane packing).
    TB = min(tile_b, _round_up(B, 16))
    TB = max(16, (TB // 16) * 16)
    B_pad = _round_up(B, TB)
    if B_pad != B:
        pad = ((0, B_pad - B), (0, 0))
        e_re_h = jnp.pad(e_re_h, pad)
        e_im_h = jnp.pad(e_im_h, pad)
        e_re_t = jnp.pad(e_re_t, pad)
        e_im_t = jnp.pad(e_im_t, pad)
        rs = jnp.pad(rs, (0, B_pad - B))
    rs2d = rs.astype(jnp.int32).reshape(B_pad, 1)

    # Explicit VMEM budget: 4 double-buffered entity streams + resident rel
    # tables + index/output tiles + headroom; capped at 64 MiB (v7x physical).
    esz = jnp.dtype(e_re_h.dtype).itemsize
    rsz = jnp.dtype(rel_re.dtype).itemsize
    vmem_bytes = (2 * 4 * TB * D * esz          # entity streams, double-buffered
                  + 2 * TB * 4                  # rs tile
                  + 2 * 2 * R_pad * D * rsz     # resident relation tables
                  + 2 * 2 * TB * 4              # output tile
                  + (8 << 20))                  # headroom / internal scratch
    vmem_bytes = int(min(max(vmem_bytes, 16 << 20), 64 << 20))

    ent_spec = pl.BlockSpec((TB, D), lambda i: (i, 0))
    rel_spec = pl.BlockSpec((R_pad, D), lambda i: (0, 0))   # constant -> resident

    out = pl.pallas_call(
        _complex_score_kernel,
        out_shape=jax.ShapeDtypeStruct((B_pad, 1), jnp.float32),
        grid=(B_pad // TB,),
        in_specs=[pl.BlockSpec((TB, 1), lambda i: (i, 0)),
                  ent_spec, ent_spec, ent_spec, ent_spec,
                  rel_spec, rel_spec],
        out_specs=pl.BlockSpec((TB, 1), lambda i: (i, 0)),
        compiler_params=pltpu.CompilerParams(
            dimension_semantics=("parallel",),
            vmem_limit_bytes=vmem_bytes),
    )(rs2d, e_re_h, e_im_h, e_re_t, e_im_t, rel_re, rel_im)
    return out[:B, 0]


def xavier_uniform(key, shape, dtype=jnp.float32):
    # torch nn.init.xavier_uniform_ on a (num, dim) embedding weight.
    limit = (6.0 / (shape[0] + shape[1])) ** 0.5
    return jax.random.uniform(key, shape, dtype, minval=-limit, maxval=limit)


class ComplExPallas:
    """ComplEx scoring (forward path of the PyTorch module) backed by Pallas.

    Embedding tables are stored in bfloat16 for HBM bandwidth; all arithmetic
    runs in float32 inside the kernel.
    """

    def __init__(self, num_ent, num_rel, emb_dim, key, emb_dtype=jnp.bfloat16):
        k1, k2, k3, k4 = jax.random.split(key, 4)
        self.num_ent = num_ent
        self.num_rel = num_rel
        self.emb_dim = emb_dim
        self.ent_re = xavier_uniform(k1, (num_ent, emb_dim)).astype(emb_dtype)
        self.ent_im = xavier_uniform(k2, (num_ent, emb_dim)).astype(emb_dtype)
        self.rel_re = xavier_uniform(k3, (num_rel, emb_dim)).astype(emb_dtype)
        self.rel_im = xavier_uniform(k4, (num_rel, emb_dim)).astype(emb_dtype)

    def forward(self, batch):
        # batch: (B, 3) int32 of (head, relation, tail) indices.
        hs = batch[:, 0]
        rs = batch[:, 1]
        ts = batch[:, 2]
        # Entity-row gathers (plain-JAX glue).
        # TODO(synk): fuse these gathers into the kernel (manual DMA gather keyed
        # on scalar-prefetched hs/ts) to stop materializing four (B, D)
        # intermediates in HBM; relations are already gathered in-kernel.
        e_re_h = self.ent_re[hs]
        e_im_h = self.ent_im[hs]
        e_re_t = self.ent_re[ts]
        e_im_t = self.ent_im[ts]
        return complex_score(rs, e_re_h, e_im_h, e_re_t, e_im_t,
                             self.rel_re, self.rel_im)

    def forward_ref(self, batch):
        hs, rs, ts = batch[:, 0], batch[:, 1], batch[:, 2]
        f32 = jnp.float32
        h_re = self.ent_re[hs].astype(f32)
        h_im = self.ent_im[hs].astype(f32)
        t_re = self.ent_re[ts].astype(f32)
        t_im = self.ent_im[ts].astype(f32)
        r_re = self.rel_re[rs].astype(f32)
        r_im = self.rel_im[rs].astype(f32)
        return jnp.sum(r_re * h_re * t_re + r_re * h_im * t_im
                       + r_im * h_re * t_im - r_im * h_im * t_re, axis=1)

    # TODO(synk): forward_bce / get_score (scoring against every entity via
    # full-table matmuls), dropout, and the loss helpers are not ported here.


if __name__ == "__main__":
    km, kh, kr, kt = jax.random.split(jax.random.PRNGKey(0), 4)
    num_ent, num_rel, emb_dim = 64, 8, 128   # emb_dim kept a multiple of 128
    batch_size = 32

    model = ComplExPallas(num_ent, num_rel, emb_dim, km)

    hs = jax.random.randint(kh, (batch_size,), 0, num_ent, dtype=jnp.int32)
    rs = jax.random.randint(kr, (batch_size,), 0, num_rel, dtype=jnp.int32)
    ts = jax.random.randint(kt, (batch_size,), 0, num_ent, dtype=jnp.int32)
    batch = jnp.stack([hs, rs, ts], axis=1)  # (B, 3) int32

    score = jax.block_until_ready(model.forward(batch))
    ref = jax.block_until_ready(model.forward_ref(batch))

    assert score.shape == (batch_size,)
    assert jnp.allclose(score, ref, atol=1e-5, rtol=1e-4), (
        float(jnp.max(jnp.abs(score - ref))))
    print("KERNEL_OK")
</pallas_src>

<mosaic_0001>
module attributes {stable_mosaic.version = 11 : i64} {
  func.func @_complex_score_kernel(%arg0: i32, %arg1: memref<32x1xi32, #tpu.memory_space<vmem>>, %arg2: memref<32x128xbf16, #tpu.memory_space<vmem>>, %arg3: memref<32x128xbf16, #tpu.memory_space<vmem>>, %arg4: memref<32x128xbf16, #tpu.memory_space<vmem>>, %arg5: memref<32x128xbf16, #tpu.memory_space<vmem>>, %arg6: memref<128x128xbf16, #tpu.memory_space<vmem>>, %arg7: memref<128x128xbf16, #tpu.memory_space<vmem>>, %arg8: memref<32x1xf32, #tpu.memory_space<vmem>>) attributes {dimension_semantics = [#tpu.dimension_semantics<parallel>], iteration_bounds = array<i64: 1>, scalar_prefetch = 0 : i64, scratch_operands = 0 : i64, tpu.core_type = #tpu.core_type<tc>, window_params = [{transform_indices = @transform_0, window_bounds = array<i64: 32, 1>}, {transform_indices = @transform_1, window_bounds = array<i64: 32, 128>}, {transform_indices = @transform_2, window_bounds = array<i64: 32, 128>}, {transform_indices = @transform_3, window_bounds = array<i64: 32, 128>}, {transform_indices = @transform_4, window_bounds = array<i64: 32, 128>}, {pipeline_mode = #tpu.pipeline_mode<synchronous>, transform_indices = @transform_5, window_bounds = array<i64: 128, 128>}, {pipeline_mode = #tpu.pipeline_mode<synchronous>, transform_indices = @transform_6, window_bounds = array<i64: 128, 128>}, {transform_indices = @transform_7, window_bounds = array<i64: 32, 1>}]} {
    %c0 = arith.constant 0 : index
    %c0_0 = arith.constant 0 : index
    %0 = vector.load %arg2[%c0, %c0_0] : memref<32x128xbf16, #tpu.memory_space<vmem>>, vector<32x128xbf16>
    %1 = arith.extf %0 : vector<32x128xbf16> to vector<32x128xf32>
    %c0_1 = arith.constant 0 : index
    %c0_2 = arith.constant 0 : index
    %2 = vector.load %arg3[%c0_1, %c0_2] : memref<32x128xbf16, #tpu.memory_space<vmem>>, vector<32x128xbf16>
    %3 = arith.extf %2 : vector<32x128xbf16> to vector<32x128xf32>
    %c0_3 = arith.constant 0 : index
    %c0_4 = arith.constant 0 : index
    %4 = vector.load %arg4[%c0_3, %c0_4] : memref<32x128xbf16, #tpu.memory_space<vmem>>, vector<32x128xbf16>
    %5 = arith.extf %4 : vector<32x128xbf16> to vector<32x128xf32>
    %c0_5 = arith.constant 0 : index
    %c0_6 = arith.constant 0 : index
    %6 = vector.load %arg5[%c0_5, %c0_6] : memref<32x128xbf16, #tpu.memory_space<vmem>>, vector<32x128xbf16>
    %7 = arith.extf %6 : vector<32x128xbf16> to vector<32x128xf32>
    %8 = arith.mulf %1, %5 : vector<32x128xf32>
    %9 = arith.mulf %3, %7 : vector<32x128xf32>
    %10 = arith.addf %8, %9 : vector<32x128xf32>
    %11 = arith.mulf %1, %7 : vector<32x128xf32>
    %12 = arith.mulf %3, %5 : vector<32x128xf32>
    %13 = arith.subf %11, %12 : vector<32x128xf32>
    %c0_7 = arith.constant 0 : index
    %c0_8 = arith.constant 0 : index
    %14 = vector.load %arg1[%c0_7, %c0_8] : memref<32x1xi32, #tpu.memory_space<vmem>>, vector<32x1xi32>
    %15 = tpu.iota {dimensions = array<i32: 1>} : vector<32x128xi32>
    %16 = vector.broadcast %14 : vector<32x1xi32> to vector<32x128xi32>
    %17 = arith.cmpi eq, %15, %16 : vector<32x128xi32>
    %cst = arith.constant 1.000000e+00 : f32
    %cst_9 = arith.constant 0.000000e+00 : f32
    %18 = vector.broadcast %cst : f32 to vector<32x128xf32>
    %19 = vector.broadcast %cst_9 : f32 to vector<32x128xf32>
    %20 = arith.select %17, %18, %19 : vector<32x128xi1>, vector<32x128xf32>
    %21 = arith.truncf %20 : vector<32x128xf32> to vector<32x128xbf16>
    %c0_10 = arith.constant 0 : index
    %c0_11 = arith.constant 0 : index
    %22 = vector.load %arg6[%c0_10, %c0_11] : memref<128x128xbf16, #tpu.memory_space<vmem>>, vector<128x128xbf16>
    %cst_12 = arith.constant dense<0.000000e+00> : vector<32x128xf32>
    %23 = tpu.matmul %21, %22, %cst_12 {dimension_numbers = #tpu.dot_dimension_numbers<[1], [0], [0], [1], [0, 0, 1, 1], [], []>} : vector<32x128xbf16>, vector<128x128xbf16>, vector<32x128xf32> -> vector<32x128xf32>
    %c0_13 = arith.constant 0 : index
    %c0_14 = arith.constant 0 : index
    %24 = vector.load %arg7[%c0_13, %c0_14] : memref<128x128xbf16, #tpu.memory_space<vmem>>, vector<128x128xbf16>
    %cst_15 = arith.constant dense<0.000000e+00> : vector<32x128xf32>
    %25 = tpu.matmul %21, %24, %cst_15 {dimension_numbers = #tpu.dot_dimension_numbers<[1], [0], [0], [1], [0, 0, 1, 1], [], []>} : vector<32x128xbf16>, vector<128x128xbf16>, vector<32x128xf32> -> vector<32x128xf32>
    %26 = arith.mulf %23, %10 : vector<32x128xf32>
    %27 = arith.mulf %25, %13 : vector<32x128xf32>
    %28 = arith.addf %26, %27 : vector<32x128xf32>
    %cst_16 = arith.constant dense<0.000000e+00> : vector<32xf32>
    %29 = vector.multi_reduction <add>, %28, %cst_16 [1] : vector<32x128xf32> to vector<32xf32>
    %30 = vector.shape_cast %29 : vector<32xf32> to vector<32x1xf32>
    %c0_17 = arith.constant 0 : index
    %c0_18 = arith.constant 0 : index
    %31 = vector.load %arg8[%c0_17, %c0_18] : memref<32x1xf32, #tpu.memory_space<vmem>>, vector<32x1xf32>
    tpu.vector_store %arg8[%c0_17, %c0_18], %30 {strides = array<i32>} : memref<32x1xf32, #tpu.memory_space<vmem>>, vector<32x1xf32>,
    return
  }
  func.func @transform_0(%arg0: i32) -> (i32, i32) {
    %c0_i32 = arith.constant 0 : i32
    %c0_i32_0 = arith.constant 0 : i32
    return %arg0, %c0_i32 : i32, i32
  }
  func.func @transform_1(%arg0: i32) -> (i32, i32) {
    %c0_i32 = arith.constant 0 : i32
    %c0_i32_0 = arith.constant 0 : i32
    return %arg0, %c0_i32 : i32, i32
  }
  func.func @transform_2(%arg0: i32) -> (i32, i32) {
    %c0_i32 = arith.constant 0 : i32
    %c0_i32_0 = arith.constant 0 : i32
    return %arg0, %c0_i32 : i32, i32
  }
  func.func @transform_3(%arg0: i32) -> (i32, i32) {
    %c0_i32 = arith.constant 0 : i32
    %c0_i32_0 = arith.constant 0 : i32
    return %arg0, %c0_i32 : i32, i32
  }
  func.func @transform_4(%arg0: i32) -> (i32, i32) {
    %c0_i32 = arith.constant 0 : i32
    %c0_i32_0 = arith.constant 0 : i32
    return %arg0, %c0_i32 : i32, i32
  }
  func.func @transform_5(%arg0: i32) -> (i32, i32) {
    %c0_i32 = arith.constant 0 : i32
    %c0_i32_0 = arith.constant 0 : i32
    %c0_i32_1 = arith.constant 0 : i32
    return %c0_i32, %c0_i32_0 : i32, i32
  }
  func.func @transform_6(%arg0: i32) -> (i32, i32) {
    %c0_i32 = arith.constant 0 : i32
    %c0_i32_0 = arith.constant 0 : i32
    %c0_i32_1 = arith.constant 0 : i32
    return %c0_i32, %c0_i32_0 : i32, i32
  }
  func.func @transform_7(%arg0: i32) -> (i32, i32) {
    %c0_i32 = arith.constant 0 : i32
    %c0_i32_0 = arith.constant 0 : i32
    return %arg0, %c0_i32 : i32, i32
  }
}

</mosaic_0001>

<bundles_post_ra>
// kernel: tpu_custom_call.1
= control target key start
LH: loop header
LB: loop body
LE: loop exit
PB: predicated region body
PF: predicated region fallthrough
CT: control target
= control target key end

     0   :  { %12 = vsyncpa [#allocation3], 0  ;;  %s719_s0 = inlined_call_operand.vmem [shape: s32[32,1], index: 0, kind: input, shape index: {}]   ;;  %s720_s1 = inlined_call_operand.vmem [shape: bf16[32,128], index: 1, kind: input, shape index: {}]   ;;  %s721_s2 = inlined_call_operand.vmem [shape: bf16[32,128], index: 2, kind: input, shape index: {}]   ;;  %s722_s3 = inlined_call_operand.hbm [shape: bf16[32,128], index: 3, kind: input, shape index: {}]   ;;  %s723_s4 = inlined_call_operand.hbm [shape: bf16[32,128], index: 4, kind: input, shape index: {}]   ;;  %s724_s5 = inlined_call_operand.hbm [shape: bf16[128,128], index: 5, kind: input, shape index: {}]   ;;  %s725_s6 = inlined_call_operand.hbm [shape: bf16[128,128], index: 6, kind: input, shape index: {}]   ;;  %s726_s7 = inlined_call_operand.vmem [shape: f32[32,1], index: 7, kind: output, shape index: {}]  }
   0x1   :  { %13 = vsyncpa [#allocation5], 0 }
   0x2   :  { %14 = vsyncpa [#allocation8], 0  ;;  %s38_s26 = sshll.u32 %s723_s4, 4  ;;  %s623_s27 = smov [#allocation4]   ;;  %s39_s26 = int_to_ptr.hbm [resolvable:$true] %s38_s26 }
   0x3   :  { %s40_s28 = sshll.u32 %s623_s27, 4  ;;  %s25_s8 = sshll.u32 %s722_s3, 4  ;;  %s41_s28 = int_to_ptr.vmem [resolvable:$true] %s40_s28  ;;  %s26_s8 = int_to_ptr.hbm [resolvable:$true] %s25_s8 }
   0x4   :  { %s624_s9 = smov 64   ;;  %s625_s10 = smov 4  }
   0x5   :  { %46 = dma.hbm_to_vmem [thread:$0]  %s39_s26, 256, %s41_s28, [#allocation5], %s624_s9, %s624_s9, %s625_s10  }
   0x6   :  { %s626_s11 = smov [#allocation2]   ;;  %s51_s15 = sshll.u32 %s724_s5, 4  ;;  %s52_s15 = int_to_ptr.hbm [resolvable:$true] %s51_s15 }
   0x7   :  { %s27_s12 = sshll.u32 %s626_s11, 4  ;;  %s64_s17 = sshll.u32 %s725_s6, 4  ;;  %s28_s12 = int_to_ptr.vmem [resolvable:$true] %s27_s12  ;;  %s65_s17 = int_to_ptr.hbm [resolvable:$true] %s64_s17 }
   0x8   :  { %33 = dma.hbm_to_vmem [thread:$0]  %s26_s8, 256, %s28_s12, [#allocation3], %s624_s9, %s624_s9, %s625_s10  }
   0x9   :  { %s627_s18 = smov [#allocation6]   ;;  %s628_s3 = smov [#allocation7]  }
   0xa   :  { %s53_s19 = sshll.u32 %s627_s18, 4  ;;  %s66_s20 = sshll.u32 %s628_s3, 4  ;;  %s54_s19 = int_to_ptr.vmem [resolvable:$true] %s53_s19  ;;  %s67_s20 = int_to_ptr.vmem [resolvable:$true] %s66_s20 }
   0xb   :  { %59 = dma.hbm_to_vmem [thread:$0]  %s52_s15, 1024, %s54_s19, [#allocation5], %s624_s9, %s624_s9, %s625_s10  }
   0xc   :  { %72 = dma.hbm_to_vmem [thread:$0]  %s65_s17, 1024, %s67_s20, [#allocation8], %s624_s9, %s624_s9, %s625_s10  }
   0xd   :  { %617 = dma.done.wait [#allocation3], 256  }
   0xe   :  { %618 = vsyncadd [#allocation3], 4294967040 }
   0xf   :  { %619 = dma.done.wait [#allocation5], 1280  }
  0x10   :  { %620 = vsyncadd [#allocation5], 4294966016 }
  0x11   :  { %621 = dma.done.wait [#allocation8], 1024  }
  0x12   :  { %622 = vsyncadd [#allocation8], 4294966272  ;;  %v629_v0 = vmov 0   ;;  %v147_v1 = vld [vmem:[%s719_s0 + $0x10] sm:$0xff]  ;;  %v145_v2 = vld [vmem:[%s719_s0] sm:$0xff]  ;;  %v149_v23 = vlaneseq  ;;  %vm359_vm6 = vcmask 7168  }
  0x13   :  { %520 = vset.pattern.permute.xlu1 %v629_v0  ;;  %519 = vset.pattern.permute.xlu0 %v629_v0  ;;  %v450_v3 = vld [vmem:[#allocation6 + $0x38] sm:$0xff]  ;;  %v449_v5 = vld [vmem:[#allocation6 + $0x30] sm:$0xff]  ;;  %v146_v8 = vld [vmem:[%s719_s0 + $0x8] sm:$0xff]  ;;  %v630_v27 = vmov 1.0|1.0  }
  0x14   :  { %158 = vperm.xlu0 %519, %v147_v1   ;;  %152 = vperm.xlu1 %520, %v145_v2   ;;  %v458_v4 = vld [vmem:[#allocation7 + $0x38] sm:$0xff]  ;;  %v457_v6 = vld [vmem:[#allocation7 + $0x30] sm:$0xff]  ;;  %v448_v9 = vld [vmem:[#allocation6 + $0x28] sm:$0xff]  ;;  %v150_v24 = vand.u32 127, %v149_v23 }
  0x15   :  { %237 = vmatpush.bf16.msra.mxu0 %v450_v3  ;;  %495 = vmatpush.bf16.msra.mxu2 %v450_v3  ;;  %v148_v7 = vld [vmem:[%s719_s0 + $0x18] sm:$0xff]  ;;  %v456_v10 = vld [vmem:[#allocation7 + $0x28] sm:$0xff]  ;;  %v447_v11 = vld [vmem:[#allocation6 + $0x20] sm:$0xff] }
  0x16   :  { %320 = vmatpush.bf16.msra.mxu1 %v458_v4  ;;  %503 = vmatpush.bf16.msra.mxu3 %v458_v4  ;;  %v455_v12 = vld [vmem:[#allocation7 + $0x20] sm:$0xff]  ;;  %v446_v13 = vld [vmem:[#allocation6 + $0x18] sm:$0xff]  ;;  %v445_v15 = vld [vmem:[#allocation6 + $0x10] sm:$0xff] }
  0x17   :  { %v454_v14 = vld [vmem:[#allocation7 + $0x18] sm:$0xff]  ;;  %v453_v16 = vld [vmem:[#allocation7 + $0x10] sm:$0xff]  ;;  %v444_v17 = vld [vmem:[#allocation6 + $0x8] sm:$0xff] }
  0x18   :  { %v452_v18 = vld [vmem:[#allocation7 + $0x8] sm:$0xff]  ;;  %v443_v19 = vld [vmem:[#allocation6] sm:$0xff]  ;;  %v484_v31 = vld [vmem:[#allocation4] sm:$0xff]  }
  0x19   :  { %238 = vmatpush.bf16.msra.mxu0 %v449_v5  ;;  %496 = vmatpush.bf16.msra.mxu2 %v449_v5  ;;  %v451_v20 = vld [vmem:[#allocation7] sm:$0xff]  ;;  %v485_v35 = vunpack.c.l.bf16 %v484_v31  ;;  %v491_v36 = vld [vmem:[%s720_s1 + $0x8] sm:$0xff]   ;;  %v494_v39 = vld [vmem:[#allocation4 + $0x8] sm:$0xff]   ;;  %v486_v51 = vunpack.c.h.bf16 %v484_v31 }
  0x1a   :  { %321 = vmatpush.bf16.msra.mxu1 %v457_v6  ;;  %504 = vmatpush.bf16.msra.mxu3 %v457_v6  ;;  %v460_v28 = vld [vmem:[%s720_s1] sm:$0xff]   ;;  %v492_v37 = vld [vmem:[%s721_s2 + $0x8] sm:$0xff]   ;;  %v465_v44 = vunpack.c.l.bf16 %v491_v36  ;;  %v489_v47 = vunpack.c.l.bf16 %v494_v39  ;;  %v466_v0 = vunpack.c.h.bf16 %v491_v36 }
  0x1b   :  { %v468_v29 = vld [vmem:[%s721_s2] sm:$0xff]   ;;  %v461_v32 = vunpack.c.l.bf16 %v460_v28  ;;  %v493_v38 = vld [vmem:[#allocation2 + $0x8] sm:$0xff]   ;;  %v473_v45 = vunpack.c.l.bf16 %v492_v37  ;;  %v462_v48 = vunpack.c.h.bf16 %v460_v28  ;;  %v474_v3 = vunpack.c.h.bf16 %v492_v37 }
  0x1c   :  { %161 = vperm.xlu0 %519, %v148_v7   ;;  %155 = vperm.xlu1 %520, %v146_v8   ;;  %v476_v30 = vld [vmem:[#allocation2] sm:$0xff]   ;;  %v469_v33 = vunpack.c.l.bf16 %v468_v29  ;;  %v481_v46 = vunpack.c.l.bf16 %v493_v38  ;;  %v470_v50 = vunpack.c.h.bf16 %v468_v29  ;;  %v135_v56 = vmul.f32 %v489_v47, %v465_v44 }
  0x1d   :  { %239 = vmatpush.bf16.msra.mxu0 %v448_v9  ;;  %497 = vmatpush.bf16.msra.mxu2 %v448_v9  ;;  %v477_v34 = vunpack.c.l.bf16 %v476_v30  ;;  %v133_v42 = vmul.f32 %v485_v35, %v461_v32  ;;  %v478_v49 = vunpack.c.h.bf16 %v476_v30  ;;  %v127_v55 = vmul.f32 %v489_v47, %v473_v45 }
  0x1e   :  { %322 = vmatpush.bf16.msra.mxu1 %v456_v10  ;;  %505 = vmatpush.bf16.msra.mxu3 %v456_v10  ;;  %v125_v41 = vmul.f32 %v485_v35, %v469_v33  ;;  %v123_v54 = vmul.f32 %v481_v46, %v465_v44  ;;  %v139_v57 = vmul.f32 %v481_v46, %v473_v45  ;;  %v482_v4 = vunpack.c.h.bf16 %v493_v38 }
  0x1f   :  { %v121_v40 = vmul.f32 %v477_v34, %v461_v32  ;;  %v137_v43 = vmul.f32 %v477_v34, %v469_v33  ;;  %v122_v58 = vmul.f32 %v478_v49, %v462_v48  ;;  %v126_v61 = vmul.f32 %v486_v51, %v470_v50 }
  0x20   :  { %v134_v62 = vmul.f32 %v486_v51, %v462_v48  ;;  %v138_v63 = vmul.f32 %v478_v49, %v470_v50  ;;  %v131_v5 = vadd.f32 %v127_v55, %v123_v54  ;;  %v143_v6 = vsub.f32 %v135_v56, %v139_v57 }
  0x21   :  { %240 = vmatpush.bf16.msra.mxu0 %v447_v11  ;;  %498 = vmatpush.bf16.msra.mxu2 %v447_v11  ;;  %v129_v52 = vadd.f32 %v125_v41, %v121_v40  ;;  %v141_v53 = vsub.f32 %v133_v42, %v137_v43  ;;  %v490_v7 = vunpack.c.h.bf16 %v494_v39  ;;  %v130_v11 = vadd.f32 %v126_v61, %v122_v58 }
  0x22   :  { %323 = vmatpush.bf16.msra.mxu1 %v455_v12  ;;  %506 = vmatpush.bf16.msra.mxu3 %v455_v12  ;;  %v142_v12 = vsub.f32 %v134_v62, %v138_v63 }
  0x25   :  { %241 = vmatpush.bf16.msra.mxu0 %v446_v13  ;;  %499 = vmatpush.bf16.msra.mxu2 %v446_v13  ;;  %v124_v13 = vmul.f32 %v482_v4, %v466_v0 }
  0x26   :  { %324 = vmatpush.bf16.msra.mxu1 %v454_v14  ;;  %507 = vmatpush.bf16.msra.mxu3 %v454_v14  ;;  %v140_v14 = vmul.f32 %v482_v4, %v474_v3 }
  0x29   :  { %242 = vmatpush.bf16.msra.mxu0 %v445_v15  ;;  %500 = vmatpush.bf16.msra.mxu2 %v445_v15 }
  0x2a   :  { %325 = vmatpush.bf16.msra.mxu1 %v453_v16  ;;  %508 = vmatpush.bf16.msra.mxu3 %v453_v16 }
  0x2d   :  { %243 = vmatpush.bf16.msra.mxu0 %v444_v17  ;;  %501 = vmatpush.bf16.msra.mxu2 %v444_v17  ;;  %v128_v17 = vmul.f32 %v490_v7, %v474_v3 }
  0x2e   :  { %326 = vmatpush.bf16.msra.mxu1 %v452_v18  ;;  %509 = vmatpush.bf16.msra.mxu3 %v452_v18  ;;  %v136_v18 = vmul.f32 %v490_v7, %v466_v0 }
  0x31   :  { %244 = vmatpush.bf16.msra.mxu0 %v443_v19  ;;  %502 = vmatpush.bf16.msra.mxu2 %v443_v19 }
  0x32   :  { %327 = vmatpush.bf16.msra.mxu1 %v451_v20  ;;  %510 = vmatpush.bf16.msra.mxu3 %v451_v20 }
  0x86   :  { %v159_v21 = vpop.permute.xlu0 %158  ;;  %v153_v22 = vpop.permute.xlu1 %152 }
  0x87   :  { %vm165_vm0 = vcmp.eq.s32.totalorder %v150_v24, %v159_v21  ;;  %vm163_vm3 = vcmp.eq.s32.totalorder %v150_v24, %v153_v22 }
  0x8e   :  { %v162_v25 = vpop.permute.xlu0 %161  ;;  %v156_v26 = vpop.permute.xlu1 %155 }
  0x8f   :  { %vm166_vm1 = vcmp.eq.s32.totalorder %v150_v24, %v162_v25  ;;  %vm164_vm2 = vcmp.eq.s32.totalorder %v150_v24, %v156_v26  ;;  %v132_v24 = vadd.f32 %v128_v17, %v124_v13  ;;  %v144_v25 = vsub.f32 %v136_v18, %v140_v14 }
  0x90   :  { %vm405_vm4 = vmpackc.low %vm166_vm1, %vm165_vm0 }
  0x91   :  { %vm403_vm5 = vmpackc.low %vm164_vm2, %vm163_vm3  ;;  %406 = vmatmul.msk.bf16.vlgmr.msra.gmra.mxu2 %vm405_vm4, %v630_v27  ;;  %442 = vmatmul.msk.bf16.vlgmr.msra.gmra.mxu3 %vm405_vm4, %v630_v27 }
  0x92   :  { %404 = vmatmul.msk.bf16.vlgmr.msra.gmra.mxu0 %vm403_vm5, %v630_v27  ;;  %440 = vmatmul.msk.bf16.vlgmr.msra.gmra.mxu1 %vm403_vm5, %v630_v27 }
 0x10f   :  { %v246_v59 = vpop.f32.mrf.mxu0  ;;  %v329_v60 = vpop.f32.mrf.mxu1 }
 0x110   :  { %v339_v1 = vmul.f32 %v246_v59, %v129_v52  ;;  %v343_v2 = vmul.f32 %v329_v60, %v141_v53 }
 0x112   :  { %v347_v8 = vadd.f32 %v343_v2, %v339_v1 }
 0x114   :  { %351 = vadd.xlane.f32.xlu2 %v347_v8  ;;  %v251_v9 = vpop.f32.mrf.mxu2  ;;  %v334_v10 = vpop.f32.mrf.mxu3 }
 0x115   :  { %v341_v15 = vmul.f32 %v251_v9, %v131_v5  ;;  %v345_v16 = vmul.f32 %v334_v10, %v143_v6 }
 0x117   :  { %v248_v19 = vpop.f32.mrf.mxu0  ;;  %v331_v20 = vpop.f32.mrf.mxu1  ;;  %v349_v21 = vadd.f32 %v345_v16, %v341_v15 }
 0x118   :  { %v340_v22 = vmul.f32 %v248_v19, %v130_v11  ;;  %v344_v23 = vmul.f32 %v331_v20, %v142_v12 }
 0x119   :  { %355 = vadd.xlane.f32.xlu0 %v349_v21 }
 0x11a   :  { %v348_v26 = vadd.f32 %v344_v23, %v340_v22 }
 0x11c   :  { %353 = vadd.xlane.f32.xlu2 %v348_v26  ;;  %v253_v27 = vpop.f32.mrf.mxu2  ;;  %v336_v28 = vpop.f32.mrf.mxu3 }
 0x11d   :  { %v342_v29 = vmul.f32 %v253_v27, %v132_v24  ;;  %v346_v30 = vmul.f32 %v336_v28, %v144_v25 }
 0x11f   :  { %v350_v31 = vadd.f32 %v346_v30, %v342_v29 }
 0x121   :  { %357 = vadd.xlane.f32.xlu1 %v350_v31 }
 0x187   :  { %v352_v32 = vpop.xlane.xlu2 %351 }
 0x188   :  { %360 = vst.msk [vmem:[%s726_s7] sm:$0xff] %vm359_vm6, %v352_v32 }
 0x18c   :  { %v356_v33 = vpop.xlane.xlu0 %355 }
 0x18d   :  { %362 = vst.msk [vmem:[%s726_s7 + $0x10] sm:$0xff] %vm359_vm6, %v356_v33 }
 0x18f   :  { %v354_v34 = vpop.xlane.xlu2 %353 }
 0x190   :  { %361 = vst.msk [vmem:[%s726_s7 + $0x8] sm:$0xff] %vm359_vm6, %v354_v34 }
 0x194   :  { %v358_v35 = vpop.xlane.xlu1 %357 }
 0x195   :  { %363 = vst.msk [vmem:[%s726_s7 + $0x18] sm:$0xff] %vm359_vm6, %v358_v35 }
 0x196   :  { %368 = vsyncpa [#allocation3], 1 }
 0x197   :  { %369 = vsyncpa [#allocation5], 1 }
 0x198   :  { %370 = vsyncpa [#allocation8], 1 }

</bundles_post_ra>
